<compile_context>
chip_gen: v6e
topology: v6e:2x2x1
jax: 0.10.0
libtpu: 0.0.40
codegen_flags: <defaults>
</compile_context>

<pallas_src>
import jax
import jax.numpy as jnp
import numpy as np
from jax.experimental import pallas as pl
from jax.experimental.pallas import tpu as pltpu


def _round_up(x, m):
    return (x + m - 1) // m * m


def _fc_ff_kernel(x_ref, w1_ref, b1_ref, w2_ref, b2_ref, o_ref):
    x = x_ref[0]                                                      # (Cin, TL)
    h = jnp.dot(w1_ref[...], x, preferred_element_type=jnp.float32)   # conv1: (Cout, TL)
    h = jnp.maximum(h + b1_ref[...], 0.0)                             # + bias, ReLU
    # TODO(synk): nn.Dropout is identity at inference; training-mode dropout not implemented.
    y = jnp.dot(w2_ref[...], h, preferred_element_type=jnp.float32)   # conv2: (Cout, TL)
    o_ref[0] = y + b2_ref[...]


def fc_feed_forward(x, w1, b1, w2, b2, *, max_tile_l=512):
    """FCFeedForward forward.  x:(B,Cin,L), w1:(Cout,Cin), w2:(Cout,Cout), b*: (Cout,1)."""
    B, Cin, L = x.shape
    Cout = w1.shape[0]
    # lane-dense tiling over the length axis
    TL = min(max_tile_l, _round_up(L, 128))
    Lp = _round_up(L, TL)
    if Lp != L:
        x = jnp.pad(x, ((0, 0), (0, 0), (0, Lp - L)))
    grid = (B, Lp // TL)
    y = pl.pallas_call(
        _fc_ff_kernel,
        out_shape=jax.ShapeDtypeStruct((B, Cout, Lp), jnp.float32),
        grid=grid,
        in_specs=[
            pl.BlockSpec((1, Cin, TL), lambda b, j: (b, 0, j)),   # activation tile
            pl.BlockSpec((Cout, Cin), lambda b, j: (0, 0)),       # W1 (resident)
            pl.BlockSpec((Cout, 1), lambda b, j: (0, 0)),         # b1
            pl.BlockSpec((Cout, Cout), lambda b, j: (0, 0)),      # W2 (resident)
            pl.BlockSpec((Cout, 1), lambda b, j: (0, 0)),         # b2
        ],
        out_specs=pl.BlockSpec((1, Cout, TL), lambda b, j: (b, 0, j)),
        compiler_params=pltpu.CompilerParams(
            dimension_semantics=("parallel", "parallel")),
    )(x, w1, b1, w2, b2)
    return y[:, :, :L]


def init_params(key, in_channels, out_channels):
    """Deterministic params matching nn.Conv1d(k=1) shapes; biases pre-shaped (Cout, 1)."""
    k1, k2, k3, k4 = jax.random.split(key, 4)
    w1 = jax.random.normal(k1, (out_channels, in_channels), jnp.float32) / np.sqrt(in_channels)
    b1 = jax.random.normal(k2, (out_channels, 1), jnp.float32) * 0.01
    w2 = jax.random.normal(k3, (out_channels, out_channels), jnp.float32) / np.sqrt(out_channels)
    b2 = jax.random.normal(k4, (out_channels, 1), jnp.float32) * 0.01
    return w1, b1, w2, b2


def fc_feed_forward_ref(x, w1, b1, w2, b2):
    """Pure-JAX reference of the PyTorch forward (for correctness check)."""
    h = jnp.maximum(jnp.einsum('oc,bcl->bol', w1, x) + b1[None], 0.0)
    return jnp.einsum('oc,bcl->bol', w2, h) + b2[None]


if __name__ == "__main__":
    B, Cin, Cout, L = 2, 16, 32, 16
    key = jax.random.PRNGKey(0)
    kp, kx = jax.random.split(key)
    w1, b1, w2, b2 = init_params(kp, Cin, Cout)
    x = jax.random.normal(kx, (B, Cin, L), jnp.float32)

    out = fc_feed_forward(x, w1, b1, w2, b2)
    jax.block_until_ready(out)
    assert out.shape == (B, Cout, L)

    ref = fc_feed_forward_ref(x, w1, b1, w2, b2)
    assert jnp.allclose(out, ref, atol=1e-4, rtol=1e-4), float(jnp.max(jnp.abs(out - ref)))
    print("KERNEL_OK")
</pallas_src>

<mosaic_0001>
module attributes {stable_mosaic.version = 11 : i64} {
  func.func @_fc_ff_kernel(%arg0: i32, %arg1: i32, %arg2: memref<1x16x128xf32, #tpu.memory_space<vmem>>, %arg3: memref<32x16xf32, #tpu.memory_space<vmem>>, %arg4: memref<32x1xf32, #tpu.memory_space<vmem>>, %arg5: memref<32x32xf32, #tpu.memory_space<vmem>>, %arg6: memref<32x1xf32, #tpu.memory_space<vmem>>, %arg7: memref<1x32x128xf32, #tpu.memory_space<vmem>>) attributes {dimension_semantics = [#tpu.dimension_semantics<parallel>, #tpu.dimension_semantics<parallel>], iteration_bounds = array<i64: 2, 1>, scalar_prefetch = 0 : i64, scratch_operands = 0 : i64, tpu.core_type = #tpu.core_type<tc>, window_params = [{transform_indices = @transform_0, window_bounds = array<i64: 1, 16, 128>}, {pipeline_mode = #tpu.pipeline_mode<synchronous>, transform_indices = @transform_1, window_bounds = array<i64: 32, 16>}, {pipeline_mode = #tpu.pipeline_mode<synchronous>, transform_indices = @transform_2, window_bounds = array<i64: 32, 1>}, {pipeline_mode = #tpu.pipeline_mode<synchronous>, transform_indices = @transform_3, window_bounds = array<i64: 32, 32>}, {pipeline_mode = #tpu.pipeline_mode<synchronous>, transform_indices = @transform_4, window_bounds = array<i64: 32, 1>}, {transform_indices = @transform_5, window_bounds = array<i64: 1, 32, 128>}]} {
    %c0 = arith.constant 0 : index
    %c0_0 = arith.constant 0 : index
    %c0_1 = arith.constant 0 : index
    %0 = vector.load %arg2[%c0, %c0_0, %c0_1] : memref<1x16x128xf32, #tpu.memory_space<vmem>>, vector<1x16x128xf32>
    %1 = vector.shape_cast %0 : vector<1x16x128xf32> to vector<16x128xf32>
    %c0_2 = arith.constant 0 : index
    %c0_3 = arith.constant 0 : index
    %2 = vector.load %arg3[%c0_2, %c0_3] : memref<32x16xf32, #tpu.memory_space<vmem>>, vector<32x16xf32>
    %cst = arith.constant dense<0.000000e+00> : vector<32x128xf32>
    %3 = tpu.matmul %2, %1, %cst {dimension_numbers = #tpu.dot_dimension_numbers<[1], [0], [0], [1], [0, 0, 1, 1], [], []>} : vector<32x16xf32>, vector<16x128xf32>, vector<32x128xf32> -> vector<32x128xf32>
    %c0_4 = arith.constant 0 : index
    %c0_5 = arith.constant 0 : index
    %4 = vector.load %arg4[%c0_4, %c0_5] : memref<32x1xf32, #tpu.memory_space<vmem>>, vector<32x1xf32>
    %5 = vector.broadcast %4 : vector<32x1xf32> to vector<32x128xf32>
    %6 = arith.addf %3, %5 : vector<32x128xf32>
    %cst_6 = arith.constant 0.000000e+00 : f32
    %7 = vector.broadcast %cst_6 : f32 to vector<32x128xf32>
    %8 = arith.maximumf %6, %7 : vector<32x128xf32>
    %c0_7 = arith.constant 0 : index
    %c0_8 = arith.constant 0 : index
    %9 = vector.load %arg5[%c0_7, %c0_8] : memref<32x32xf32, #tpu.memory_space<vmem>>, vector<32x32xf32>
    %cst_9 = arith.constant dense<0.000000e+00> : vector<32x128xf32>
    %10 = tpu.matmul %9, %8, %cst_9 {dimension_numbers = #tpu.dot_dimension_numbers<[1], [0], [0], [1], [0, 0, 1, 1], [], []>} : vector<32x32xf32>, vector<32x128xf32>, vector<32x128xf32> -> vector<32x128xf32>
    %c0_10 = arith.constant 0 : index
    %c0_11 = arith.constant 0 : index
    %11 = vector.load %arg6[%c0_10, %c0_11] : memref<32x1xf32, #tpu.memory_space<vmem>>, vector<32x1xf32>
    %12 = vector.broadcast %11 : vector<32x1xf32> to vector<32x128xf32>
    %13 = arith.addf %10, %12 : vector<32x128xf32>
    %c0_12 = arith.constant 0 : index
    %c0_13 = arith.constant 0 : index
    %c0_14 = arith.constant 0 : index
    %14 = vector.load %arg7[%c0_12, %c0_13, %c0_14] : memref<1x32x128xf32, #tpu.memory_space<vmem>>, vector<1x32x128xf32>
    %15 = vector.shape_cast %14 : vector<1x32x128xf32> to vector<32x128xf32>
    %16 = vector.shape_cast %13 : vector<32x128xf32> to vector<1x32x128xf32>
    tpu.vector_store %arg7[%c0_12, %c0_13, %c0_14], %16 {strides = array<i32>} : memref<1x32x128xf32, #tpu.memory_space<vmem>>, vector<1x32x128xf32>,
    return
  }
  func.func @transform_0(%arg0: i32, %arg1: i32) -> (i32, i32, i32) {
    %c0_i32 = arith.constant 0 : i32
    %c0_i32_0 = arith.constant 0 : i32
    return %arg0, %c0_i32, %arg1 : i32, i32, i32
  }
  func.func @transform_1(%arg0: i32, %arg1: i32) -> (i32, i32) {
    %c0_i32 = arith.constant 0 : i32
    %c0_i32_0 = arith.constant 0 : i32
    %c0_i32_1 = arith.constant 0 : i32
    return %c0_i32, %c0_i32_0 : i32, i32
  }
  func.func @transform_2(%arg0: i32, %arg1: i32) -> (i32, i32) {
    %c0_i32 = arith.constant 0 : i32
    %c0_i32_0 = arith.constant 0 : i32
    %c0_i32_1 = arith.constant 0 : i32
    return %c0_i32, %c0_i32_0 : i32, i32
  }
  func.func @transform_3(%arg0: i32, %arg1: i32) -> (i32, i32) {
    %c0_i32 = arith.constant 0 : i32
    %c0_i32_0 = arith.constant 0 : i32
    %c0_i32_1 = arith.constant 0 : i32
    return %c0_i32, %c0_i32_0 : i32, i32
  }
  func.func @transform_4(%arg0: i32, %arg1: i32) -> (i32, i32) {
    %c0_i32 = arith.constant 0 : i32
    %c0_i32_0 = arith.constant 0 : i32
    %c0_i32_1 = arith.constant 0 : i32
    return %c0_i32, %c0_i32_0 : i32, i32
  }
  func.func @transform_5(%arg0: i32, %arg1: i32) -> (i32, i32, i32) {
    %c0_i32 = arith.constant 0 : i32
    %c0_i32_0 = arith.constant 0 : i32
    return %arg0, %c0_i32, %arg1 : i32, i32, i32
  }
}

</mosaic_0001>

<bundles_post_ra>
// kernel: tpu_custom_call.1
= control target key start
LH: loop header
LB: loop body
LE: loop exit
PB: predicated region body
PF: predicated region fallthrough
CT: control target
= control target key end

     0   :  { %10 = vsyncpa [#allocation3], 0  ;;  %s1006_s0 = inlined_call_operand.vmem [shape: f32[2,16,128], index: 0, kind: input, shape index: {}]   ;;  %s1007_s1 = inlined_call_operand.vmem [shape: f32[32,16], index: 1, kind: input, shape index: {}]   ;;  %s1008_s2 = inlined_call_operand.vmem [shape: f32[32,1], index: 2, kind: input, shape index: {}]   ;;  %s1009_s3 = inlined_call_operand.vmem [shape: f32[32,32], index: 3, kind: input, shape index: {}]   ;;  %s1010_s4 = inlined_call_operand.vmem [shape: f32[32,1], index: 4, kind: input, shape index: {}]   ;;  %s1011_s5 = inlined_call_operand.hbm [shape: f32[2,32,128], index: 5, kind: output, shape index: {}]  }
   0x1   :  { %12 = vsyncpa [#allocation3 + $0x1], 0  ;;  %s836_s18 = smov 0   ;;  %s838_s19 = smov 0  }
   0x2   :  { %s840_s20 = smov 0   ;;  %s842_s21 = smov 0  }
   0x3   :  { %s844_s22 = smov 0   ;;  %s846_s23 = smov 0  }
   0x4 LB: > { %s603_s24 = sadd.s32 4294967295, %s800_s23   ;;  %s604_s25 = sadd.s32 4294967294, %s800_s23   ;;  %s800_s23 = sphi %s846_s23, %s18_s23   ;;  %s796_s22 = sphi %s844_s22, %s1018_s22   ;;  %s792_s21 = sphi %s842_s21, %s1017_s21   ;;  %s788_s20 = sphi %s840_s20, %s1016_s20   ;;  %s784_s19 = sphi %s838_s19, %s1015_s19   ;;  %s780_s18 = sphi %s836_s18, %s1014_s18  }
   0x5   : > { %s30_s26 = sadd.s32 1, %s796_s22  ;;  %s151_s27 = sadd.s32 1, %s788_s20 }
   0x6   : > { %p32_p0 = scmp.ge.s32.totalorder %s30_s26, 2  ;;  %p161_p1 = scmp.ne.s32.totalorder %s788_s20, %s784_s19 }
   0x7   : > { %p162_p2 = scmp.eq.s32.totalorder %s603_s24, 1  ;;  %p167_p3 = scmp.ne.s32.totalorder %s784_s19, %s780_s18 }
   0x8   : > { %s1020_s26 = smov (%p32_p0, %s30_s26), 0  ;;  %p168_p5 = scmp.eq.s32.totalorder %s604_s25, 1 }
   0x9   : > { %p876_p4 = por %p162_p2, %p161_p1  ;;  %s146_s29 = ssub.s32 %s796_s22, %s1020_s26 }
   0xa   : > { %p607_p6 = scmp.ge.s32.totalorder %s800_s23, 1  ;;  %p149_p7 = scmp.eq.s32.totalorder %s146_s29, 0 }
   0xb   : > { %p883_p8 = por %p168_p5, %p167_p3  ;;  %p209_p9 = scmp.lt.s32.totalorder %s800_s23, 3 }
   0xc   : > { %s889_s6 = scalar_select %p149_p7, %s788_s20, %s151_s27  }
   0xd   : > { %p210_p10 = pnand %p607_p6, %p209_p9 }
   0xe   : > { %p240_p11 = scmp.lt.s32.totalorder (!%p210_p10), %s792_s21, 1  ;;  %s237_s14 = sand.u32 (!%p210_p10), 1, %s784_s19  }
   0xf   : > { %213 = sbr.rel (%p210_p10) target bundleno = 453 (0x1c5), region = 40  ;;  %s608_s15 = sshll.u32 (!%p210_p10), %s237_s14, 5 }
  0x10   : > { %s625_s24 = sshll.u32 (!%p210_p10), %s792_s21, 9  ;;  %s803_s8 = smov (!%p210_p10), [#allocation2]  }
  0x11   : > { %s728_s9 = sshll.u32 (!%p210_p10), %s803_s8, 4  ;;  %s729_s9 = int_to_ptr.vmem [resolvable:$false] %s728_s9 }
  0x12   : > { %s730_s10 = scalar_lea.vmem (!%p210_p10), %s729_s9, 1024 }
  0x14   : > { %v250_v0 = vld [vmem:[%s1007_s1] sm:$0xff]  ;;  %vm278_vm0 = vcmask 130048   ;;  %v802_v1 = vmov 0   ;;  %v257_v2 = vld [vmem:[%s1008_s2 + $0x18] sm:$0xff]  ;;  %s241_s11 = scalar_select %p240_p11, %s792_s21, 1  ;;  %v255_v3 = vld [vmem:[%s1008_s2 + $0x8] sm:$0xff] }
  0x15   : > { %644 = vmatprep.mubr.msk.f32.mxu0 %vm278_vm0, %v250_v0  ;;  %722 = vset.pattern.permute.xlu0 %v802_v1  ;;  %v256_v4 = vld [vmem:[%s1008_s2 + $0x10] sm:$0xff]  ;;  %v254_v5 = vld [vmem:[%s1008_s2] sm:$0xff]  ;;  %v251_v9 = vld [vmem:[%s1007_s1 + $0x8] sm:$0xff]  ;;  %vm408_vm1 = vcmask 261120   ;;  %s961_s21 = scalar_lea.sflag [#allocation3], %s237_s14 }
  0x16   : > { %275 = vperm.xlu0 %722, %v257_v2   ;;  %723 = vset.pattern.permute.xlu1 %v802_v1  ;;  %s624_s16 = sshll.u32 %s241_s11, 4  ;;  %v384_v8 = vld [vmem:[%s1010_s4] sm:$0xff]  ;;  %v385_v10 = vld [vmem:[%s1010_s4 + $0x8] sm:$0xff]  ;;  %v252_v11 = vld [vmem:[%s1007_s1 + $0x10] sm:$0xff] }
  0x17   : > { %265 = vperm.xlu1 %723, %v255_v3   ;;  %s247_s29 = scalar_lea.vmem %s1006_s0, %s624_s16  ;;  %v386_v12 = vld [vmem:[%s1010_s4 + $0x10] sm:$0xff]  ;;  %v253_v13 = vld [vmem:[%s1007_s1 + $0x18] sm:$0xff]  ;;  %v380_v15 = vld [vmem:[%s1009_s3] sm:$0xff]  ;;  %s239_s16 = scalar_lea.vmem [#allocation2], %s608_s15 }
  0x18   : > { %v249_v6 = vld [vmem:[%s247_s29 + $0x8] sm:$0xff]  ;;  %v248_v7 = vld [vmem:[%s247_s29] sm:$0xff]  ;;  %v387_v14 = vld [vmem:[%s1010_s4 + $0x18] sm:$0xff]  ;;  %658 = vmatprep.mubr.msk.f32.mxu1 %vm408_vm1, %v380_v15  ;;  %s525_s17 = sshll.u32 %s239_s16, 4  ;;  %s959_s29 = scalar_lea.hbm %s1011_s5, %s625_s24  ;;  %s954_s17 = int_to_ptr.vmem [resolvable:$true] %s525_s17 }
  0x19   : > { %640 = vmatprep.subr.mxu0 %v249_v6  ;;  %v381_v32 = vld [vmem:[%s1009_s3 + $0x8] sm:$0xff]  ;;  %v382_v33 = vld [vmem:[%s1009_s3 + $0x10] sm:$0xff]  ;;  %v383_v34 = vld [vmem:[%s1009_s3 + $0x18] sm:$0xff]  ;;  %s724_s7 = scalar_lea.vmem %s954_s17, 512  ;;  %p731_p1 = scmp.lt.s32.totalorder %s954_s17, %s729_s9 }
  0x1a   : > { %270 = vperm.xlu0 %722, %v256_v4   ;;  %641 = vmatpush3.msra.mxu0 %v249_v6  ;;  %p725_p12 = scmp.ne.s32.totalorder %s954_s17, %s724_s7  ;;  %p732_p2 = scmp.lt.s32.totalorder %s730_s10, %s724_s7 }
  0x1b   : > { %260 = vperm.xlu1 %723, %v254_v5   ;;  %642 = vmatprep.subr.mxu0 %v248_v7 }
  0x1c   : > { %643 = vmatpush3.msra.mxu0 %v248_v7  ;;  %p726_p13 = pnand %p725_p12, %p876_p4  ;;  %p733_p3 = por %p732_p2, %p731_p1 }
  0x1d   : > { %645 = vmatmul.mubr.msk.f32.vlgmr.msra.gmra.mxu0 %vm278_vm0, %v251_v9 }
  0x1e   : > { %390 = vperm.xlu0 %722, %v384_v8   ;;  %647 = vmatprep.mubr.msk.f32.mxu0 %vm278_vm0, %v252_v11  ;;  %p727_p0 = pneg %p726_p13 }
  0x1f   : > { %395 = vperm.xlu1 %723, %v385_v10  }
  0x20   : > { %p734_p5 = pnand %p733_p3, %p727_p0 }
  0x21   : > { %648 = vmatmul.mubr.msk.f32.gmra.mxu0 %vm278_vm0, %v253_v13 }
  0x22   : > { %400 = vperm.xlu0 %722, %v386_v12  }
  0x23   : > { %405 = vperm.xlu1 %723, %v387_v14  }
  0x91   : > { %v276_v16 = vpop.permute.xlu0 %275 }
  0x92   : > { %v266_v18 = vpop.permute.xlu1 %265 }
  0x95   : > { %v271_v22 = vpop.permute.xlu0 %270 }
  0x96   : > { %v261_v27 = vpop.permute.xlu1 %260 }
  0x99   : > { %v391_v36 = vpop.permute.xlu0 %390 }
  0x9a   : > { %v396_v35 = vpop.permute.xlu1 %395 }
  0x9d   : > { %v401_v44 = vpop.permute.xlu0 %400 }
  0x9e   : > { %v406_v41 = vpop.permute.xlu1 %405 }
  0xdd   : > { %v646_v17 = vpop.f32.mrf.mxu0 }
  0xde   : > { %v363_v24 = vadd.f32 %v646_v17, %v266_v18 }
  0xdf   : > { %v357_v19 = vpop.f32.mrf.mxu0 }
  0xe0   : > { %v358_v28 = vadd.f32 %v357_v19, %v261_v27  ;;  %v377_v30 = vmax.f32 %v363_v24, 0.0 }
  0xe1   : > { %v649_v20 = vpop.f32.mrf.mxu0 }
  0xe2   : > { %v373_v21 = vadd.f32 %v649_v20, %v276_v16  ;;  %v376_v31 = vmax.f32 %v358_v28, 0.0 }
  0xe3   : > { %v367_v23 = vpop.f32.mrf.mxu0 }
  0xe4   : > { %v379_v25 = vmax.f32 %v373_v21, 0.0  ;;  %v368_v26 = vadd.f32 %v367_v23, %v271_v22 }
  0xe6   : > { %v378_v29 = vmax.f32 %v368_v26, 0.0  ;;  %650 = vmatprep.subr.mxu1 %v379_v25 }
  0xe7   : > { %651 = vmatpush3.msra.mxu1 %v379_v25 }
  0xe8   : > { %652 = vmatprep.subr.mxu1 %v378_v29 }
  0xe9   : > { %653 = vmatpush3.msra.mxu1 %v378_v29 }
  0xea   : > { %654 = vmatprep.subr.mxu1 %v377_v30 }
  0xeb   : > { %655 = vmatpush3.msra.mxu1 %v377_v30 }
  0xec   : > { %656 = vmatprep.subr.mxu1 %v376_v31 }
  0xed   : > { %657 = vmatpush3.msra.mxu1 %v376_v31 }
  0xee   : > { %659 = vmatmul.mubr.msk.f32.vlgmr.msra.gmra.mxu1 %vm408_vm1, %v381_v32 }
  0xef   : > { %661 = vmatprep.mubr.msk.f32.mxu1 %vm408_vm1, %v382_v33 }
  0xf2   : > { %662 = vmatmul.mubr.msk.f32.gmra.mxu1 %vm408_vm1, %v383_v34 }
 0x1ae   : > { %v660_v37 = vpop.f32.mrf.mxu1 }
 0x1af   : > { %v493_v38 = vadd.f32 %v660_v37, %v396_v35 }
 0x1b0   : > { %v487_v39 = vpop.f32.mrf.mxu1 }
 0x1b1   : > { %507 = vst [vmem:[%s239_s16 + $0x8] sm:$0xff] %v493_v38  ;;  %v488_v40 = vadd.f32 %v487_v39, %v391_v36 }
 0x1b2   : > { %v663_v42 = vpop.f32.mrf.mxu1 }
 0x1b3   : > { %506 = vst [vmem:[%s239_s16] sm:$0xff] %v488_v40  ;;  %v503_v43 = vadd.f32 %v663_v42, %v406_v41 }
 0x1b4   : > { %v497_v45 = vpop.f32.mrf.mxu1 }
 0x1b5   : > { %509 = vst [vmem:[%s239_s16 + $0x18] sm:$0xff] %v503_v43  ;;  %v498_v46 = vadd.f32 %v497_v45, %v401_v44 }
 0x1b7   : > { %508 = vst [vmem:[%s239_s16 + $0x10] sm:$0xff] %v498_v46 }
 0x1b8   : > { %737 = shalt.err (!%p734_p5)
}
 0x1b9   : > { %s738_s11 = scalar_lea.hbm %s959_s29, 512  ;;  %s742_s14 = scalar_lea.hbm %s1011_s5, 1024 }
 0x1ba   : > { %p739_p6 = scmp.ne.s32.totalorder %s959_s29, %s738_s11  ;;  %p743_p10 = scmp.lt.s32.totalorder %s959_s29, %s1011_s5 }
 0x1bb   : > { %p744_p11 = scmp.lt.s32.totalorder %s742_s14, %s738_s11 }
 0x1bc   : > { %p740_p7 = pnand %p739_p6, %p876_p4 }
 0x1bd   : > { %p745_p12 = por %p744_p11, %p743_p10 }
 0x1be   : > { %p741_p9 = pneg %p740_p7 }
 0x1c0   : > { %p746_p13 = pnand %p745_p12, %p741_p9 }
 0x1c2   : > { %749 = shalt.err (!%p746_p13)
}
 0x1c3   : > { %s804_s24 = smov 128   ;;  %s805_s25 = smov 8  }
 0x1c4   : > { %664 = dma.vmem_to_hbm [thread:$0]  (%p876_p4), %s954_s17, 512, %s959_s29, %s961_s21, %s804_s24, %s804_s24, %s805_s25  }
 0x1c5 PF: > { %p670_p0 = scmp.ge.s32.totalorder %s800_s23, 2  ;;  %s540_s27 = sand.u32 1, %s780_s18  }
 0x1c6   : > { %s541_s7 = scalar_lea.sflag [#allocation3], %s540_s27 }
 0x1c7   : > { %p667_p1 = pnand %p670_p0, %p883_p8 }
 0x1c9   : > { %p668_p2 = pneg %p667_p1 }
 0x1cb   : > { %775 = dma.done.wait (%p668_p2), %s541_s7, 512  }
 0x1cc   : > { %777 = vsyncadd (%p668_p2), %s541_s7, 4294966784  ;;  %s18_s23 = sadd.s32 1, %s800_s23   ;;  %s1014_s18 = smov %s784_s19 }
 0x1cd   : > { %p15_p3 = scmp.ge.s32.totalorder %s18_s23, 4   ;;  %s1015_s19 = smov %s788_s20 }
 0x1ce   : > { %s1016_s20 = smov %s889_s6  ;;  %s1017_s21 = smov %s796_s22 }
 0x1cf   : > { %s1018_s22 = smov %s1020_s26  ;;  %17 = sbr.rel (!%p15_p3) target bundleno = 4 (0x4), region = 75 }
 0x1d4   :  { %546 = vsyncpa [#allocation3], 1 }
 0x1d5   :  { %548 = vsyncpa [#allocation3 + $0x1], 1 }

</bundles_post_ra>
